<compile_context>
chip_gen: v7x
topology: tpu7x:2x2x1
jax: 0.10.0
libtpu: 0.0.40
codegen_flags: <defaults>
</compile_context>

<pallas_src>
import jax
import jax.numpy as jnp
from jax.experimental import pallas as pl
from jax.experimental.pallas import tpu as pltpu


def _num_tensorcores() -> int:
    """Best-effort TensorCore count (2 on v7x, 1 on v5e/v6e); defaults to 1."""
    try:
        info = pltpu.get_tpu_info()
        for attr in ("num_cores", "core_count", "num_tensorcores", "tensorcore_count"):
            v = getattr(info, attr, None)
            if v:
                return int(v)
    except Exception:
        pass
    try:
        kind = jax.devices()[0].device_kind.lower()
        if "v7" in kind or "7x" in kind:
            return 2
    except Exception:
        pass
    return 1


def _ragged_block_cfg():
    """(block_bytes, vmem_limit_bytes) for the masked VMEM fallback path."""
    try:
        vmem = pltpu.get_tpu_info().vmem_capacity_bytes
        if vmem >= 128 * 1024 * 1024:          # v5e / v6e: bigger blocks are safe
            return 8 * 1024 * 1024, 64 * 1024 * 1024
    except Exception:
        pass
    return 4 * 1024 * 1024, 32 * 1024 * 1024   # v7x-safe (32 MiB scoped VMEM)


def _pick_cols(n: int) -> int:
    """Widest lane-dense column count dividing n that still leaves >=4 rows."""
    divisors = [c for c in (32768, 16384, 8192, 4096, 2048, 1024, 512, 256, 128)
                if n % c == 0]
    if not divisors:
        return 0
    for c in divisors:
        if n // c >= 4:
            return c
    return divisors[-1]            # smallest divisor -> most rows for chunking


def _make_dma_copy_kernel(rows: int, chunk_rows: int):
    """HBM->HBM DMA copy of one row-chunk per grid step (2 concurrent sub-DMAs)."""
    if chunk_rows >= 2:
        sub_sizes = (chunk_rows // 2, chunk_rows - chunk_rows // 2)
    else:
        sub_sizes = (chunk_rows,)

    def kernel(x_hbm, o_hbm, sems):
        i = pl.program_id(0)
        # Clamp so the (possibly ragged) last chunk stays in bounds; any
        # overlap with the previous chunk rewrites identical bytes (a copy is
        # idempotent, so this is correct even with parallel cores).
        start = jnp.minimum(i * chunk_rows, rows - chunk_rows)
        copies = []
        off = 0
        for j, sz in enumerate(sub_sizes):
            cp = pltpu.make_async_copy(
                x_hbm.at[pl.ds(start + off, sz)],
                o_hbm.at[pl.ds(start + off, sz)],
                sems.at[j],
            )
            cp.start()
            copies.append(cp)
            off += sz
        for cp in copies:
            cp.wait()

    return kernel, len(sub_sizes)


def _vmem_copy_kernel(x_ref, o_ref):
    # Pure elementwise identity on a VMEM tile (ragged fallback only).
    o_ref[...] = x_ref[...]


@jax.jit
def _pallas_copy(x: jax.Array) -> jax.Array:
    """Materialize a fresh copy of `x` via Pallas TPU kernels."""
    orig_shape = x.shape
    dtype = x.dtype
    n = x.size
    if n == 0:
        return x
    itemsize = jnp.dtype(dtype).itemsize
    bytes_accessed = 2 * n * itemsize

    cols = _pick_cols(n)
    if cols:
        # ---------- main path: direct HBM->HBM DMA, no VMEM bounce ----------
        rows = n // cols
        x2d = x.reshape(rows, cols)          # layout-preserving (free) reshape

        num_cores = _num_tensorcores()
        if num_cores > 1 and rows >= num_cores:
            # v7x: one chunk per TensorCore so both cores' HBM BW is used.
            n_chunks = num_cores
            semantics = (pltpu.CORE_PARALLEL,)
        else:
            # A few chunks are enough; the DMA engine streams each at HBM BW.
            n_chunks = 4 if rows >= 4 else (2 if rows >= 2 else 1)
            semantics = ("arbitrary",)
        chunk_rows = pl.cdiv(rows, n_chunks)

        kernel, n_sems = _make_dma_copy_kernel(rows, chunk_rows)
        out2d = pl.pallas_call(
            kernel,
            out_shape=jax.ShapeDtypeStruct((rows, cols), dtype),
            grid=(n_chunks,),
            in_specs=[pl.BlockSpec(memory_space=pl.ANY)],
            out_specs=pl.BlockSpec(memory_space=pl.ANY),
            scratch_shapes=[pltpu.SemaphoreType.DMA((n_sems,))],
            compiler_params=pltpu.CompilerParams(dimension_semantics=semantics),
            cost_estimate=pl.CostEstimate(flops=0, transcendentals=0,
                                          bytes_accessed=bytes_accessed),
        )(x2d)
        return out2d.reshape(orig_shape)

    # ------ ragged path (n % 128 != 0): masked-boundary VMEM copy -----------
    # No jnp.pad / trailing slice: Pallas masks the partial last block.
    block_bytes, vmem_limit = _ragged_block_cfg()
    x2d = x.reshape(1, n)
    if n < 128:
        block_cols = n                       # full-extent block (always legal)
    else:
        block_cols = min((block_bytes // itemsize) // 128 * 128,
                         (n // 128) * 128)
    grid = (pl.cdiv(n, block_cols),)         # boundary block masked by Pallas

    out2d = pl.pallas_call(
        _vmem_copy_kernel,
        out_shape=jax.ShapeDtypeStruct((1, n), dtype),
        grid=grid,
        in_specs=[pl.BlockSpec((1, block_cols), lambda i: (0, i))],
        out_specs=pl.BlockSpec((1, block_cols), lambda i: (0, i)),
        compiler_params=pltpu.CompilerParams(
            dimension_semantics=("arbitrary",),
            vmem_limit_bytes=vmem_limit,
        ),
        cost_estimate=pl.CostEstimate(flops=0, transcendentals=0,
                                      bytes_accessed=bytes_accessed),
    )(x2d)
    return out2d.reshape(orig_shape)


def identity(x: jax.Array, *, force_copy: bool = False) -> jax.Array:
    """Identity forward pass.

    Returns `x` unchanged by default (zero HBM traffic -- the optimal
    nn.Identity).  `force_copy=True` materializes a fresh output buffer via
    the Pallas copy kernel.
    """
    if not force_copy:
        return x
    return _pallas_copy(x)


if __name__ == "__main__":
    key = jax.random.PRNGKey(0)
    x = jax.random.normal(key, (2, 4, 16, 16), dtype=jnp.float32)  # NCHW

    # Zero-copy fast path: true nn.Identity semantics, no kernel launched.
    y_alias = identity(x)
    assert y_alias is x

    # Materialized copy through the direct HBM->HBM DMA kernel (n % 128 == 0).
    y = identity(x, force_copy=True)
    jax.block_until_ready(y)
    assert y.shape == x.shape and y.dtype == x.dtype
    assert bool(jnp.all(y == x))

    # bf16 input: same DMA path, dtype-agnostic byte copy.
    xb = jax.random.normal(jax.random.PRNGKey(1), (2, 4, 8, 16), dtype=jnp.bfloat16)
    yb = identity(xb, force_copy=True)
    jax.block_until_ready(yb)
    assert yb.dtype == xb.dtype and bool(jnp.all(yb == xb))

    # Ragged element count (201 % 128 != 0): masked-boundary VMEM copy path,
    # with no pad + slice round trips.
    xr = jax.random.normal(jax.random.PRNGKey(2), (3, 67), dtype=jnp.float32)
    yr = identity(xr, force_copy=True)
    jax.block_until_ready(yr)
    assert yr.shape == xr.shape and bool(jnp.all(yr == xr))

    print("KERNEL_OK")
</pallas_src>

<mosaic_0001>
module attributes {stable_mosaic.version = 11 : i64} {
  func.func @kernel(%arg0: i32, %arg1: memref<4x512xf32, #tpu.memory_space<any>>, %arg2: memref<4x512xf32, #tpu.memory_space<any>>, %arg3: memref<1x!tpu.dma_semaphore, #tpu.memory_space<semaphore_mem>>) attributes {dimension_semantics = [#tpu.dimension_semantics<arbitrary>], iteration_bounds = array<i64: 4>, scalar_prefetch = 0 : i64, scratch_operands = 1 : i64, tpu.core_type = #tpu.core_type<tc>, window_params = [{}, {}]} {
    %c1_i32 = arith.constant 1 : i32
    %0 = arith.muli %arg0, %c1_i32 : i32
    %c3_i32 = arith.constant 3 : i32
    %1 = arith.minsi %0, %c3_i32 : i32
    %c0_i32 = arith.constant 0 : i32
    %2 = arith.addi %1, %c0_i32 : i32
    %c0_i32_0 = arith.constant 0 : i32
    %3 = arith.addi %1, %c0_i32_0 : i32
    %c0_i32_1 = arith.constant 0 : i32
    %c0_i32_2 = arith.constant 0 : i32
    %4 = tpu.memref_slice %arg1[%2, %c0_i32_2] : memref<4x512xf32, #tpu.memory_space<any>> -> memref<1x512xf32, #tpu.memory_space<any>>
    %c0_i32_3 = arith.constant 0 : i32
    %5 = tpu.memref_slice %arg2[%3, %c0_i32_3] : memref<4x512xf32, #tpu.memory_space<any>> -> memref<1x512xf32, #tpu.memory_space<any>>
    %6 = tpu.memref_slice %arg3[%c0_i32_1] : memref<1x!tpu.dma_semaphore, #tpu.memory_space<semaphore_mem>> -> memref<1x!tpu.dma_semaphore, #tpu.memory_space<semaphore_mem>>
    %7 = tpu.memref_squeeze %6 : memref<1x!tpu.dma_semaphore, #tpu.memory_space<semaphore_mem>> -> memref<!tpu.dma_semaphore, #tpu.memory_space<semaphore_mem>>
    tpu.enqueue_dma source(%4 : memref<1x512xf32, #tpu.memory_space<any>>) target(%5 : memref<1x512xf32, #tpu.memory_space<any>>) target_semaphore(%7 : memref<!tpu.dma_semaphore, #tpu.memory_space<semaphore_mem>>)
    %c0_i32_4 = arith.constant 0 : i32
    %c0_i32_5 = arith.constant 0 : i32
    %8 = tpu.memref_slice %arg1[%2, %c0_i32_5] : memref<4x512xf32, #tpu.memory_space<any>> -> memref<1x512xf32, #tpu.memory_space<any>>
    %c0_i32_6 = arith.constant 0 : i32
    %9 = tpu.memref_slice %arg2[%3, %c0_i32_6] : memref<4x512xf32, #tpu.memory_space<any>> -> memref<1x512xf32, #tpu.memory_space<any>>
    %10 = tpu.memref_slice %arg3[%c0_i32_4] : memref<1x!tpu.dma_semaphore, #tpu.memory_space<semaphore_mem>> -> memref<1x!tpu.dma_semaphore, #tpu.memory_space<semaphore_mem>>
    %11 = tpu.memref_squeeze %10 : memref<1x!tpu.dma_semaphore, #tpu.memory_space<semaphore_mem>> -> memref<!tpu.dma_semaphore, #tpu.memory_space<semaphore_mem>>
    tpu.wait_dma2 semaphore(%11 : memref<!tpu.dma_semaphore, #tpu.memory_space<semaphore_mem>>) src(%8 : memref<1x512xf32, #tpu.memory_space<any>>) dst(%9 : memref<1x512xf32, #tpu.memory_space<any>>)
    return
  }
}

</mosaic_0001>

<bundles_post_ra>
// kernel: _pallas_copy.1
= control target key start
LH: loop header
LB: loop body
LE: loop exit
PB: predicated region body
PF: predicated region fallthrough
CT: control target
= control target key end

     0   :  { %s123_s6 = smov 0   ;;  %s143_s0 = inlined_call_operand.vmem [shape: f32[4,512], index: 0, kind: input, shape index: {}]   ;;  %s144_s1 = inlined_call_operand.vmem [shape: f32[4,512], index: 1, kind: output, shape index: {}]  }
   0x1 LB: > { %p13_p0 = scmp.lt.s32.totalorder %s125_s6, 3  ;;  %s125_s6 = sphi %s123_s6, %s11_s6  }
   0x3   : > { %s14_s7 = scalar_select %p13_p0, %s125_s6, 3 }
   0x5   : > { %s15_s8 = sshrl.u32 %s14_s7, 2  ;;  %s16_s9 = sand.u32 3, %s14_s7  }
   0x6   : > { %s107_s10 = sshll.u32 %s15_s8, 4 }
   0x7   : > { %s18_s11 = sadd.s32 %s107_s10, %s16_s9 }
   0x8   : > { %s19_s14 = scalar_lea.vmem %s143_s0, %s18_s11  ;;  %s20_s17 = scalar_lea.vmem %s144_s1, %s18_s11 }
   0x9   : > { %v38_v0 = vld [vmem:[%s19_s14] sm:$0x1]  ;;  %v40_v1 = vld [vmem:[%s19_s14 + $0x4] sm:$0x1]  ;;  %v42_v2 = vld [vmem:[%s19_s14 + $0x8] sm:$0x1] }
   0xa   : > { %39 = vst [vmem:[%s20_s17] sm:$0x1] %v38_v0  ;;  %41 = vst [vmem:[%s20_s17 + $0x4] sm:$0x1] %v40_v1  ;;  %v44_v3 = vld [vmem:[%s19_s14 + $0xc] sm:$0x1] }
   0xb   : > { %43 = vst [vmem:[%s20_s17 + $0x8] sm:$0x1] %v42_v2  ;;  %45 = vst [vmem:[%s20_s17 + $0xc] sm:$0x1] %v44_v3 }
   0xc   : > { %76 = vsyncadd [#allocation2], 64 }
   0xd   : > { %121 = dma.done.wait [#allocation2], 64 }
   0xe   : > { %122 = vsyncadd [#allocation2], 4294967232  ;;  %s11_s6 = sadd.s32 1, %s125_s6  }
   0xf   : > { %p8_p1 = scmp.ge.s32.totalorder %s11_s6, 4  }
  0x11   :  { %10 = sbr.rel (!%p8_p1) target bundleno = 1 (0x1), region = 61 }
  0x18   :  { %80 = vsyncmov [#allocation2] }
  0x1b   :  { %s81_s18 = vpop.sfrf %80 }
  0x1c   :  { %p108_p2 = scmp.ne.s32.totalorder %s81_s18, 0 }
  0x1e   :  { %85 = shalt.err (%p108_p2)  }

</bundles_post_ra>
